<compile_context>
chip_gen: v6e
topology: v6e:2x2x1
jax: 0.10.0
libtpu: 0.0.40
codegen_flags: <defaults>
</compile_context>

<pallas_src>
import math
import warnings

import numpy as np
import jax
import jax.numpy as jnp
from jax import lax
from jax.experimental import pallas as pl
from jax.experimental.pallas import tpu as pltpu

# ---- module constants (pre-solved for cap A=4, switch T=1.9) ----
_A = 4.0
_T = 1.9
_MU = 1.665
_SIG = 0.1813
_SQRT2 = 1.4142135623730951
_DENOM = _SIG * _SQRT2
_INV_DENOM = 1.0 / _DENOM            # multiply instead of divide in-kernel

# Laplace-branch fit band in z = (x - mu)/(sigma*sqrt2).
_Z_LO = (_T - _MU) / _DENOM          # ~0.9165  (x = T)
_Z_HI = 4.0                          # 2*erfc(4) ~ 3e-8 -> clamping above is exact in f32
_X_HI = _MU + _Z_HI * _DENOM
_X_MID = 0.5 * (_T + _X_HI)
_U_SCALE = 2.0 / (_X_HI - _T)        # x in [T, X_HI]  ->  u in [-1, 1]

# Tiling: ~2 MiB f32 per block; in+out double-buffered ~8 MiB -> fits v5e's
# 16 MiB default scoped VMEM (and v6e/v7x defaults) with headroom.
_TARGET_BLOCK_ELEMS = 512 * 1024
_LANE_CANDIDATES = (512, 256, 128)


def _fit_gauss_poly():
    """Fit P(u) ~ 2*exp(z^2)*erfc(z) on z in [Z_LO, Z_HI] (u = affine map to [-1,1]).

    The least-squares fit is weighted by exp(-z^2) (with a small floor to keep
    coefficients tame) so that the *actual output* error
        | (4 - exp(-z^2) P) - (4 - 2 erfc(z)) | = exp(-z^2) |P - 2 e^{z^2} erfc|
    is what gets minimized.  Returns (max output error on the band, coefficients
    in the power basis of u, lowest order first).
    """
    z = np.linspace(_Z_LO, _Z_HI, 4001)
    u = 2.0 * (z - _Z_LO) / (_Z_HI - _Z_LO) - 1.0
    erfc = np.array([math.erfc(float(v)) for v in z])
    target = 2.0 * np.exp(z * z) * erfc          # smooth, O(1) on the band
    out_w = np.exp(-z * z)                       # true output-error weight
    fit_w = np.maximum(out_w, 1e-4)              # floor -> well-behaved coefficients
    cheb = np.polynomial.chebyshev
    best_err, best_coeffs = np.inf, None
    with warnings.catch_warnings():
        warnings.simplefilter("ignore")
        for deg in range(4, 15):
            c = cheb.chebfit(u, target, deg, w=fit_w)
            err = float(np.max(out_w * np.abs(cheb.chebval(u, c) - target)))
            if err < best_err:
                best_err, best_coeffs = err, cheb.cheb2poly(c)
            if best_err <= 5e-7:
                break
    return best_err, tuple(float(v) for v in best_coeffs)


_POLY_ERR, _POLY = _fit_gauss_poly()
_USE_POLY = _POLY_ERR <= 2e-6   # safety fallback to lax.erf (not expected to trigger)


def _lap4pwc1_kernel(x_ref, o_ref):
    # Cast to f32 in-kernel; input stays in its original dtype in HBM.
    x = x_ref[...].astype(jnp.float32)

    # Lower branches via relu-square: 0 for x<=0, x^2 for 0<x<=T.
    r = jnp.maximum(x, 0.0)
    sq = r * r

    z = (x - _MU) * _INV_DENOM
    if _USE_POLY:
        # Laplace branch:  4 - exp(-z^2) * P(u)   (exp runs on the EUP slot).
        g = jnp.exp(-(z * z))
        # Clamp u at the top: for x > X_HI the branch saturates at A=4 to within
        # ~6e-8.  (Below T the branch is discarded by the select, so no lower clamp.)
        u = jnp.minimum((x - _X_MID) * _U_SCALE, 1.0)
        p = _POLY[-1]
        for c in _POLY[-2::-1]:
            p = p * u + c
        lap = _A - g * p
    else:
        # TODO(synk): fallback only if the import-time fit unexpectedly misses tolerance.
        lap = (0.5 * _A) * (1.0 + lax.erf(z))

    o_ref[...] = jnp.where(x > _T, lap, sq).astype(o_ref.dtype)


def _pick_row_tile(rows: int, lane: int) -> int:
    """Rows per block: ~2 MiB blocks, and >=2 grid steps when possible (v7x 2-TC)."""
    max_rows = max(8, _TARGET_BLOCK_ELEMS // lane)
    if rows <= 8:
        return rows                      # single full-extent block
    half = -(-rows // 2)                 # ceil(rows / 2)
    half = -(-half // 8) * 8             # round up to a sublane multiple
    return max(8, min(max_rows, half))


def lap4pwc1(x: jax.Array) -> jax.Array:
    """Apply the Lap4PWC1 activation elementwise (any shape, NCHW expected)."""
    orig_shape = x.shape
    dtype = x.dtype
    xf = x.reshape(-1)
    n = xf.shape[0]
    if n == 0:
        return x

    # Widest lane count in {512,256,128} that divides n -> free reshape, zero
    # extra HBM passes.  Only truly unaligned sizes pay a pad + tail slice.
    lane = next((c for c in _LANE_CANDIDATES if n % c == 0), None)
    padded = False
    if lane is None:
        lane = 128
        n_pad = pl.cdiv(n, lane) * lane
        # TODO(synk): remaining extra HBM pass (pad + tail slice) only on sizes
        # that are not a multiple of 128; aligned sizes are fully zero-copy.
        xf = jnp.pad(xf, (0, n_pad - n))
        padded = True
    else:
        n_pad = n

    rows = n_pad // lane
    x2d = xf.reshape(rows, lane)
    row_tile = _pick_row_tile(rows, lane)
    grid = (pl.cdiv(rows, row_tile),)

    out = pl.pallas_call(
        _lap4pwc1_kernel,
        out_shape=jax.ShapeDtypeStruct((rows, lane), dtype),
        grid_spec=pltpu.PrefetchScalarGridSpec(
            num_scalar_prefetch=0,
            grid=grid,
            in_specs=[pl.BlockSpec((row_tile, lane), lambda i: (i, 0))],
            out_specs=pl.BlockSpec((row_tile, lane), lambda i: (i, 0)),
        ),
        compiler_params=pltpu.CompilerParams(
            dimension_semantics=("parallel",)
        ),
    )(x2d)

    y = out.reshape(-1)
    if padded:
        y = y[:n]
    return y.reshape(orig_shape)


def _reference(x: jax.Array) -> jax.Array:
    """Pure-JAX reference mirroring the PyTorch forward (uses exact lax.erf)."""
    xf = x.astype(jnp.float32)
    sq = xf * xf
    z = (xf - _MU) / (_SIG * _SQRT2)
    lap = 0.5 * _A * (1.0 + lax.erf(z))
    y = jnp.where((xf > 0.0) & (xf <= _T), sq, 0.0)
    y = jnp.where(xf > _T, lap, y)
    return y.astype(x.dtype)


if __name__ == "__main__":
    key = jax.random.PRNGKey(0)
    k0, k1, k2 = jax.random.split(key, 3)

    # NCHW input consistent with a conv-activation usage (512-aligned size).
    x = jax.random.normal(k0, (2, 4, 16, 16), dtype=jnp.float32) * 2.0
    y = jax.block_until_ready(lap4pwc1(x))
    y_ref = _reference(x)
    assert y.shape == x.shape and y.dtype == x.dtype
    assert jnp.allclose(y, y_ref, atol=1e-5, rtol=1e-5), "mismatch vs reference (aligned)"

    # 256-aligned (but not 512-aligned) size: zero-copy path, multi-block grid
    # with a ragged last row-block.
    x2 = jax.random.normal(k1, (2, 3, 40, 16), dtype=jnp.float32) * 2.0
    y2 = jax.block_until_ready(lap4pwc1(x2))
    y2_ref = _reference(x2)
    assert y2.shape == x2.shape and y2.dtype == x2.dtype
    assert jnp.allclose(y2, y2_ref, atol=1e-5, rtol=1e-5), "mismatch vs reference (256-aligned)"

    # Truly ragged size to exercise the pad/slice fallback path.
    x3 = jax.random.normal(k2, (3, 5, 7, 11), dtype=jnp.float32) * 2.0
    y3 = jax.block_until_ready(lap4pwc1(x3))
    y3_ref = _reference(x3)
    assert y3.shape == x3.shape and y3.dtype == x3.dtype
    assert jnp.allclose(y3, y3_ref, atol=1e-5, rtol=1e-5), "mismatch vs reference (ragged)"

    print("KERNEL_OK")
</pallas_src>

<mosaic_0001>
module attributes {stable_mosaic.version = 11 : i64} {
  func.func @_lap4pwc1_kernel(%arg0: i32, %arg1: memref<4x512xf32, #tpu.memory_space<vmem>>, %arg2: memref<4x512xf32, #tpu.memory_space<vmem>>) attributes {dimension_semantics = [#tpu.dimension_semantics<parallel>], iteration_bounds = array<i64: 1>, scalar_prefetch = 0 : i64, scratch_operands = 0 : i64, tpu.core_type = #tpu.core_type<tc>, window_params = [{transform_indices = @transform_0, window_bounds = array<i64: 4, 512>}, {transform_indices = @transform_1, window_bounds = array<i64: 4, 512>}]} {
    %c0 = arith.constant 0 : index
    %c0_0 = arith.constant 0 : index
    %0 = vector.load %arg1[%c0, %c0_0] : memref<4x512xf32, #tpu.memory_space<vmem>>, vector<4x512xf32>
    %cst = arith.constant 0.000000e+00 : f32
    %1 = vector.broadcast %cst : f32 to vector<4x512xf32>
    %2 = arith.maximumf %0, %1 : vector<4x512xf32>
    %3 = arith.mulf %2, %2 : vector<4x512xf32>
    %cst_1 = arith.constant 1.665000e+00 : f32
    %4 = vector.broadcast %cst_1 : f32 to vector<4x512xf32>
    %5 = arith.subf %0, %4 : vector<4x512xf32>
    %cst_2 = arith.constant 3.90020299 : f32
    %6 = vector.broadcast %cst_2 : f32 to vector<4x512xf32>
    %7 = arith.mulf %5, %6 : vector<4x512xf32>
    %8 = arith.mulf %7, %7 : vector<4x512xf32>
    %cst_3 = arith.constant 0.000000e+00 : f32
    %9 = vector.broadcast %cst_3 : f32 to vector<4x512xf32>
    %10 = arith.subf %9, %8 : vector<4x512xf32>
    %11 = math.exp %10 : vector<4x512xf32>
    %cst_4 = arith.constant 2.29529381 : f32
    %12 = vector.broadcast %cst_4 : f32 to vector<4x512xf32>
    %13 = arith.subf %0, %12 : vector<4x512xf32>
    %cst_5 = arith.constant 2.5297637 : f32
    %14 = vector.broadcast %cst_5 : f32 to vector<4x512xf32>
    %15 = arith.mulf %13, %14 : vector<4x512xf32>
    %cst_6 = arith.constant 1.000000e+00 : f32
    %16 = vector.broadcast %cst_6 : f32 to vector<4x512xf32>
    %17 = arith.minimumf %15, %16 : vector<4x512xf32>
    %cst_7 = arith.constant 0.00460692728 : f32
    %18 = vector.broadcast %cst_7 : f32 to vector<4x512xf32>
    %19 = arith.mulf %18, %17 : vector<4x512xf32>
    %cst_8 = arith.constant -6.84721744E-5 : f32
    %20 = vector.broadcast %cst_8 : f32 to vector<4x512xf32>
    %21 = arith.addf %19, %20 : vector<4x512xf32>
    %22 = arith.mulf %21, %17 : vector<4x512xf32>
    %cst_9 = arith.constant 0.0029621704 : f32
    %23 = vector.broadcast %cst_9 : f32 to vector<4x512xf32>
    %24 = arith.addf %22, %23 : vector<4x512xf32>
    %25 = arith.mulf %24, %17 : vector<4x512xf32>
    %cst_10 = arith.constant -0.0179244801 : f32
    %26 = vector.broadcast %cst_10 : f32 to vector<4x512xf32>
    %27 = arith.addf %25, %26 : vector<4x512xf32>
    %28 = arith.mulf %27, %17 : vector<4x512xf32>
    %cst_11 = arith.constant 0.0293177869 : f32
    %29 = vector.broadcast %cst_11 : f32 to vector<4x512xf32>
    %30 = arith.addf %28, %29 : vector<4x512xf32>
    %31 = arith.mulf %30, %17 : vector<4x512xf32>
    %cst_12 = arith.constant -0.0605251454 : f32
    %32 = vector.broadcast %cst_12 : f32 to vector<4x512xf32>
    %33 = arith.addf %31, %32 : vector<4x512xf32>
    %34 = arith.mulf %33, %17 : vector<4x512xf32>
    %cst_13 = arith.constant 0.123962216 : f32
    %35 = vector.broadcast %cst_13 : f32 to vector<4x512xf32>
    %36 = arith.addf %34, %35 : vector<4x512xf32>
    %37 = arith.mulf %36, %17 : vector<4x512xf32>
    %cst_14 = arith.constant -0.235743523 : f32
    %38 = vector.broadcast %cst_14 : f32 to vector<4x512xf32>
    %39 = arith.addf %37, %38 : vector<4x512xf32>
    %40 = arith.mulf %39, %17 : vector<4x512xf32>
    %cst_15 = arith.constant 0.427902609 : f32
    %41 = vector.broadcast %cst_15 : f32 to vector<4x512xf32>
    %42 = arith.addf %40, %41 : vector<4x512xf32>
    %43 = arith.mulf %11, %42 : vector<4x512xf32>
    %cst_16 = arith.constant 4.000000e+00 : f32
    %44 = vector.broadcast %cst_16 : f32 to vector<4x512xf32>
    %45 = arith.subf %44, %43 : vector<4x512xf32>
    %cst_17 = arith.constant 1.900000e+00 : f32
    %46 = vector.broadcast %cst_17 : f32 to vector<4x512xf32>
    %47 = arith.cmpf ogt, %0, %46 : vector<4x512xf32>
    %48 = arith.select %47, %45, %3 : vector<4x512xi1>, vector<4x512xf32>
    %c0_18 = arith.constant 0 : index
    %c0_19 = arith.constant 0 : index
    %49 = vector.load %arg2[%c0_18, %c0_19] : memref<4x512xf32, #tpu.memory_space<vmem>>, vector<4x512xf32>
    tpu.vector_store %arg2[%c0_18, %c0_19], %48 {strides = array<i32>} : memref<4x512xf32, #tpu.memory_space<vmem>>, vector<4x512xf32>,
    return
  }
  func.func @transform_0(%arg0: i32) -> (i32, i32) {
    %c0_i32 = arith.constant 0 : i32
    %c0_i32_0 = arith.constant 0 : i32
    return %arg0, %c0_i32 : i32, i32
  }
  func.func @transform_1(%arg0: i32) -> (i32, i32) {
    %c0_i32 = arith.constant 0 : i32
    %c0_i32_0 = arith.constant 0 : i32
    return %arg0, %c0_i32 : i32, i32
  }
}

</mosaic_0001>

<bundles_post_ra>
// kernel: tpu_custom_call.1
= control target key start
LH: loop header
LB: loop body
LE: loop exit
PB: predicated region body
PF: predicated region fallthrough
CT: control target
= control target key end

     0   :  { %6 = vsyncpa [#allocation3], 0  ;;  %s186_s0 = inlined_call_operand.hbm [shape: f32[4,512], index: 0, kind: input, shape index: {}]   ;;  %s187_s1 = inlined_call_operand.hbm [shape: f32[4,512], index: 1, kind: output, shape index: {}]  }
   0x1   :  { %7 = vsyncpa [#allocation4], 0  ;;  %s156_s6 = smov [#allocation2]  }
   0x2   :  { %s14_s7 = sshll.u32 %s156_s6, 4  ;;  %s15_s7 = int_to_ptr.vmem [resolvable:$true] %s14_s7 }
   0x3   :  { %s120_s8 = scalar_lea.vmem %s15_s7, 256  ;;  %p125_p1 = scmp.lt.s32.totalorder %s15_s7, %s15_s7 }
   0x4   :  { %p121_p0 = scmp.ne.s32.totalorder %s15_s7, %s120_s8  ;;  %p126_p2 = scmp.lt.s32.totalorder %s120_s8, %s120_s8 }
   0x6   :  { %p127_p3 = por %p126_p2, %p125_p1 }
   0x8   :  { %p128_p4 = pnand %p127_p3, %p121_p0 }
   0xa   :  { %131 = shalt.err (!%p128_p4)
}
   0xb   :  { %17 = dma.hbm_to_vmem [thread:$0]  %s186_s0, 256, %s15_s7, [#allocation3]  }
   0xc   :  { %152 = dma.done.wait [#allocation3], 256  }
   0xd   :  { %153 = vsyncadd [#allocation3], 4294967040  ;;  %v171_v0 = vld [vmem:[#allocation2] sm:$0xff]  ;;  %v173_v1 = vld [vmem:[#allocation2 + $0x8] sm:$0xff]  ;;  %s157_s0 = smov [#allocation5]  }
   0xe   :  { %v104_v2 = vadd.f32 -2.2952938, %v171_v0  ;;  %v105_v3 = vadd.f32 -2.2952938, %v173_v1  ;;  %v102_v4 = vadd.f32 -1.665, %v171_v0 }
   0xf   :  { %v103_v6 = vadd.f32 -1.665, %v173_v1  ;;  %v23_v46 = vmax.f32 %v171_v0, 0.0  ;;  %v24_v49 = vmax.f32 %v173_v1, 0.0  ;;  %vm81_vm0 = vcmp.gt.f32.partialorder %v171_v0, 1.9 }
  0x10   :  { %v41_v5 = vmul.f32 2.5297637, %v104_v2  ;;  %v42_v7 = vmul.f32 2.5297637, %v105_v3  ;;  %v29_v10 = vmul.f32 3.900203, %v102_v4 }
  0x11   :  { %v30_v12 = vmul.f32 3.900203, %v103_v6  ;;  %v25_v54 = vmul.f32 %v23_v46, %v23_v46  ;;  %v26_v56 = vmul.f32 %v24_v49, %v24_v49  ;;  %s93_s11 = sshll.u32 %s157_s0, 4  ;;  %vm82_vm1 = vcmp.gt.f32.partialorder %v173_v1, 1.9  ;;  %s94_s11 = int_to_ptr.vmem [resolvable:$true] %s93_s11 }
  0x12   :  { %v43_v8 = vmin.f32 %v41_v5, 1.0  ;;  %v44_v9 = vmin.f32 %v42_v7, 1.0  ;;  %v31_v16 = vmul.f32 %v29_v10, %v29_v10  ;;  %s132_s12 = scalar_lea.vmem %s94_s11, 256  ;;  %p137_p6 = scmp.lt.s32.totalorder %s94_s11, %s94_s11 }
  0x13   :  { %v32_v18 = vmul.f32 %v30_v12, %v30_v12  ;;  %p133_p5 = scmp.ne.s32.totalorder %s94_s11, %s132_s12  ;;  %p138_p7 = scmp.lt.s32.totalorder %s132_s12, %s132_s12 }
  0x14   :  { %v45_v11 = vmul.f32 0.0046069273, %v43_v8  ;;  %v46_v13 = vmul.f32 0.0046069273, %v44_v9  ;;  %v33_v22 = vsub.f32 0.0, %v31_v16 }
  0x15   :  { %v34_v24 = vsub.f32 0.0, %v32_v18  ;;  %p139_p8 = por %p138_p7, %p137_p6 }
  0x16   :  { %v47_v14 = vadd.f32 -6.8472174e-05, %v45_v11  ;;  %v48_v15 = vadd.f32 -6.8472174e-05, %v46_v13  ;;  %v35_v28 = vmul.f32 1.442695, %v33_v22 }
  0x17   :  { %v37_v30 = vmul.f32 1.442695, %v34_v24  ;;  %p140_p9 = pnand %p139_p8, %p133_p5 }
  0x18   :  { %v49_v17 = vmul.f32 %v47_v14, %v43_v8  ;;  %v50_v19 = vmul.f32 %v48_v15, %v44_v9  ;;  %108 = vpow2.f32 %v35_v28 }
  0x19   :  { %110 = vpow2.f32 %v37_v30 }
  0x1a   :  { %v51_v20 = vadd.f32 0.0029621704, %v49_v17  ;;  %v52_v21 = vadd.f32 0.0029621704, %v50_v19 }
  0x1c   :  { %v53_v23 = vmul.f32 %v51_v20, %v43_v8  ;;  %v54_v25 = vmul.f32 %v52_v21, %v44_v9 }
  0x1e   :  { %v55_v26 = vadd.f32 -0.01792448, %v53_v23  ;;  %v56_v27 = vadd.f32 -0.01792448, %v54_v25 }
  0x20   :  { %v57_v29 = vmul.f32 %v55_v26, %v43_v8  ;;  %v58_v31 = vmul.f32 %v56_v27, %v44_v9 }
  0x22   :  { %v59_v32 = vadd.f32 0.029317787, %v57_v29  ;;  %v60_v33 = vadd.f32 0.029317787, %v58_v31 }
  0x24   :  { %v61_v34 = vmul.f32 %v59_v32, %v43_v8  ;;  %v62_v35 = vmul.f32 %v60_v33, %v44_v9 }
  0x25   :  { %v109_v48 = vpop.eup %108 }
  0x26   :  { %v63_v36 = vadd.f32 -0.060525145, %v61_v34  ;;  %v64_v37 = vadd.f32 -0.060525145, %v62_v35  ;;  %v111_v51 = vpop.eup %110 }
  0x28   :  { %v65_v38 = vmul.f32 %v63_v36, %v43_v8  ;;  %v66_v39 = vmul.f32 %v64_v37, %v44_v9 }
  0x2a   :  { %v67_v40 = vadd.f32 0.123962216, %v65_v38  ;;  %v68_v41 = vadd.f32 0.123962216, %v66_v39 }
  0x2c   :  { %v69_v42 = vmul.f32 %v67_v40, %v43_v8  ;;  %v70_v43 = vmul.f32 %v68_v41, %v44_v9 }
  0x2e   :  { %v71_v44 = vadd.f32 -0.23574352, %v69_v42  ;;  %v72_v45 = vadd.f32 -0.23574352, %v70_v43 }
  0x30   :  { %v73_v47 = vmul.f32 %v71_v44, %v43_v8  ;;  %v74_v50 = vmul.f32 %v72_v45, %v44_v9 }
  0x32   :  { %v75_v52 = vadd.f32 0.4279026, %v73_v47  ;;  %v76_v53 = vadd.f32 0.4279026, %v74_v50 }
  0x34   :  { %v77_v55 = vmul.f32 %v109_v48, %v75_v52  ;;  %v78_v57 = vmul.f32 %v111_v51, %v76_v53 }
  0x36   :  { %v79_v58 = vsub.f32 4.0, %v77_v55  ;;  %v80_v59 = vsub.f32 4.0, %v78_v57 }
  0x38   :  { %v83_v60 = vsel %vm81_vm0, %v79_v58, %v25_v54  ;;  %v84_v61 = vsel %vm82_vm1, %v80_v59, %v26_v56 }
  0x39   :  { %85 = vst [vmem:[#allocation5] sm:$0xff] %v83_v60  ;;  %86 = vst [vmem:[#allocation5 + $0x8] sm:$0xff] %v84_v61 }
  0x3a   :  { %143 = shalt.err (!%p140_p9)
}
  0x3b   :  { %96 = dma.vmem_to_hbm [thread:$0]  %s94_s11, 256, %s187_s1, [#allocation4]  }
  0x3c   :  { %154 = dma.done.wait [#allocation4], 256  }
  0x3d   :  { %155 = vsyncadd [#allocation4], 4294967040 }
  0x3e   :  { %100 = vsyncpa [#allocation3], 1 }
  0x3f   :  { %101 = vsyncpa [#allocation4], 1 }

</bundles_post_ra>
